<compile_context>
chip_gen: v7x
topology: tpu7x:2x2x1
jax: 0.10.0
libtpu: 0.0.40
codegen_flags: <defaults>
</compile_context>

<pallas_src>
import jax
import jax.numpy as jnp
from jax import lax
from jax.experimental import pallas as pl
from jax.experimental.pallas import tpu as pltpu


_LANE = 128
_SUBLANE = 8


def _round_up(x, m):
    return ((x + m - 1) // m) * m


def _make_mlp_kernel(num_hidden_layers, negative_slope=0.1,
                     compute_dtype=jnp.float32):
    """Kernel for `num_hidden_layers` (Linear+LeakyReLU) blocks followed by the
    (lane-padded) latent Linear.  Ref order:
       x, W0, b0, ..., W_{H-1}, b_{H-1}, Wz, bz, out
    """

    def kernel(x_ref, *refs):
        out_ref = refs[-1]
        h = x_ref[...]
        idx = 0
        for _ in range(num_hidden_layers):
            w = refs[idx][...]
            b = refs[idx + 1][...]
            idx += 2
            h = jnp.dot(h.astype(compute_dtype), w.astype(compute_dtype),
                        preferred_element_type=jnp.float32) + b
            # LeakyReLU(0.1): max(h, 0.1*h) -- single VALU max after the mul.
            h = jnp.maximum(h, negative_slope * h)
        wz = refs[idx][...]
        bz = refs[idx + 1][...]
        z = jnp.dot(h.astype(compute_dtype), wz.astype(compute_dtype),
                    preferred_element_type=jnp.float32) + bz
        out_ref[...] = z

    return kernel


def _bn_apply_kernel(z_ref, scale_ref, shift_ref, out_ref):
    # Affine-folded BatchNorm apply: out = z * scale + shift  (lane-dense).
    out_ref[...] = z_ref[...] * scale_ref[...] + shift_ref[...]


def engen_encoder_forward(x, weights, biases, gamma, beta, *, eps=1e-5,
                          batch_tile=None, use_bf16=False):
    """EnGen_Encoder forward.

    Args:
      x:        (B, layer_sizes[0]) float32
      weights:  list of (in, out) float32 matrices (transposed vs PyTorch);
                the last one maps to latent_size.
      biases:   list of (1, out) float32 biases matching `weights`.
      gamma:    (1, latent) BatchNorm1d weight.
      beta:     (1, latent) BatchNorm1d bias.
      batch_tile: rows per grid step (rounded up to a multiple of 8).
      use_bf16: cast matmul operands to bf16 (f32 accumulation) on v6e/v7x.
    Returns:
      (B, latent) float32 encoder output z.
    """
    x = jnp.asarray(x, jnp.float32)
    B, in_dim = x.shape
    num_hidden = len(weights) - 1
    latent = weights[-1].shape[1]
    latent_pad = _round_up(latent, _LANE)
    pad_cols = latent_pad - latent

    # --- Lane-pad the latent projection and BN params to a multiple of 128 ---
    wz = jnp.pad(jnp.asarray(weights[-1], jnp.float32), ((0, 0), (0, pad_cols)))
    bz = jnp.pad(jnp.asarray(biases[-1], jnp.float32).reshape(1, -1),
                 ((0, 0), (0, pad_cols)))
    gamma_p = jnp.pad(jnp.asarray(gamma, jnp.float32).reshape(1, -1),
                      ((0, 0), (0, pad_cols)))
    beta_p = jnp.pad(jnp.asarray(beta, jnp.float32).reshape(1, -1),
                     ((0, 0), (0, pad_cols)))

    padded_weights = [jnp.asarray(w, jnp.float32) for w in weights[:-1]] + [wz]
    padded_biases = ([jnp.asarray(b, jnp.float32).reshape(1, -1)
                      for b in biases[:-1]] + [bz])

    # --- Batch tiling: as large as reasonable, multiple of 8 sublanes --------
    if batch_tile is None:
        batch_tile = min(512, _round_up(B, _SUBLANE))
    batch_tile = max(_SUBLANE, _round_up(batch_tile, _SUBLANE))
    B_pad = _round_up(B, batch_tile)
    if B_pad != B:
        x = jnp.pad(x, ((0, B_pad - B), (0, 0)))
    num_tiles = B_pad // batch_tile

    compute_dtype = jnp.bfloat16 if use_bf16 else jnp.float32
    kernel = _make_mlp_kernel(num_hidden, compute_dtype=compute_dtype)

    params = []
    for w, b in zip(padded_weights, padded_biases):
        params.append(w)
        params.append(b)

    # Activation tile moves with the batch grid; params stay resident.
    x_spec = pl.BlockSpec((batch_tile, in_dim), lambda i: (i, 0))

    def resident_spec(a):
        shape = a.shape
        return pl.BlockSpec(shape, lambda i: tuple(0 for _ in shape))

    in_specs = [x_spec] + [resident_spec(a) for a in params]
    out_spec = pl.BlockSpec((batch_tile, latent_pad), lambda i: (i, 0))

    # --- Explicit VMEM budget (double-buffered tiles + resident params) ------
    widths = [in_dim] + [w.shape[1] for w in padded_weights]
    max_width = max(widths)
    param_bytes = sum(int(p.size) * 4 for p in params)
    act_bytes = 8 * batch_tile * max_width * 4  # in/out double buffers + slack
    vmem_limit = int(min(max(2 * param_bytes + act_bytes + (4 << 20), 16 << 20),
                         48 << 20))  # stay within v7x's 64 MiB physical VMEM

    flops = 2 * B_pad * sum(a * b for a, b in zip(widths[:-1], widths[1:]))
    bytes_accessed = int(x.size) * 4 + param_bytes + B_pad * latent_pad * 4
    cost = pl.CostEstimate(flops=flops, transcendentals=0,
                           bytes_accessed=bytes_accessed)

    z_pad = pl.pallas_call(
        kernel,
        out_shape=jax.ShapeDtypeStruct((B_pad, latent_pad), jnp.float32),
        grid=(num_tiles,),
        in_specs=in_specs,
        out_specs=out_spec,
        compiler_params=pltpu.CompilerParams(
            dimension_semantics=("parallel",),
            vmem_limit_bytes=vmem_limit),
        cost_estimate=cost,
    )(x, *params)

    # --- BatchNorm1d (training mode): full-batch statistics ------------------
    # Stats are computed over the FULL batch (outside the batch-tiled grid) so
    # tiling / megacore sharding does not change the normalization.
    # TODO(synk): running_mean / running_var updates of nn.BatchNorm1d are
    # training state and are not produced here (forward output matches).
    z = z_pad[:B]
    mean = jnp.mean(z, axis=0, keepdims=True)
    var = jnp.mean(jnp.square(z - mean), axis=0, keepdims=True)
    scale = gamma_p * lax.rsqrt(var + eps)          # (1, latent_pad)
    shift = beta_p - mean * scale                   # (1, latent_pad)

    out_pad = pl.pallas_call(
        _bn_apply_kernel,
        out_shape=jax.ShapeDtypeStruct((B_pad, latent_pad), jnp.float32),
        grid=(num_tiles,),
        in_specs=[pl.BlockSpec((batch_tile, latent_pad), lambda i: (i, 0)),
                  pl.BlockSpec((1, latent_pad), lambda i: (0, 0)),
                  pl.BlockSpec((1, latent_pad), lambda i: (0, 0))],
        out_specs=pl.BlockSpec((batch_tile, latent_pad), lambda i: (i, 0)),
        compiler_params=pltpu.CompilerParams(
            dimension_semantics=("parallel",),
            vmem_limit_bytes=vmem_limit),
    )(z_pad, scale, shift)

    return out_pad[:B, :latent]


def _init_params(key, layer_sizes, latent_size):
    """Deterministic synthetic parameters (shapes match the nn.Module)."""
    dims = list(layer_sizes) + [latent_size]
    weights, biases = [], []
    for in_size, out_size in zip(dims[:-1], dims[1:]):
        key, kw, kb = jax.random.split(key, 3)
        bound = 1.0 / jnp.sqrt(in_size)
        # Stored as (in, out): transpose of PyTorch nn.Linear.weight.
        w = jax.random.uniform(kw, (in_size, out_size), jnp.float32,
                               minval=-bound, maxval=bound)
        b = jax.random.uniform(kb, (1, out_size), jnp.float32,
                               minval=-bound, maxval=bound)
        weights.append(w)
        biases.append(b)
    gamma = jnp.ones((1, latent_size), jnp.float32)   # BatchNorm1d defaults
    beta = jnp.zeros((1, latent_size), jnp.float32)
    return weights, biases, gamma, beta


def _reference_forward(x, weights, biases, gamma, beta, eps=1e-5):
    """Pure-JAX reference for correctness check."""
    h = x
    for w, b in zip(weights[:-1], biases[:-1]):
        h = h @ w + b
        h = jnp.where(h > 0, h, 0.1 * h)
    z = h @ weights[-1] + biases[-1]
    mean = jnp.mean(z, axis=0, keepdims=True)
    var = jnp.mean((z - mean) ** 2, axis=0, keepdims=True)
    return (z - mean) / jnp.sqrt(var + eps) * gamma + beta


if __name__ == "__main__":
    # Small shapes consistent with the module: two hidden layers then latent.
    layer_sizes = [32, 64, 48]
    latent_size = 16
    batch = 16

    key = jax.random.PRNGKey(0)
    key, kx = jax.random.split(key)
    x = jax.random.normal(kx, (batch, layer_sizes[0]), jnp.float32)

    weights, biases, gamma, beta = _init_params(key, layer_sizes, latent_size)

    # batch_tile=8 exercises a 2-step batch grid while BN stays full-batch.
    z = engen_encoder_forward(x, weights, biases, gamma, beta, batch_tile=8)
    z = jax.block_until_ready(z)

    z_ref = _reference_forward(x, weights, biases, gamma, beta)
    assert z.shape == (batch, latent_size)
    assert jnp.allclose(z, z_ref, atol=1e-4, rtol=1e-4), "mismatch vs reference"

    print("KERNEL_OK")
</pallas_src>

<mosaic_0001>
module attributes {stable_mosaic.version = 11 : i64} {
  func.func @kernel(%arg0: i32, %arg1: memref<8x32xf32, #tpu.memory_space<vmem>>, %arg2: memref<32x64xf32, #tpu.memory_space<vmem>>, %arg3: memref<1x64xf32, #tpu.memory_space<vmem>>, %arg4: memref<64x48xf32, #tpu.memory_space<vmem>>, %arg5: memref<1x48xf32, #tpu.memory_space<vmem>>, %arg6: memref<48x128xf32, #tpu.memory_space<vmem>>, %arg7: memref<1x128xf32, #tpu.memory_space<vmem>>, %arg8: memref<8x128xf32, #tpu.memory_space<vmem>>) attributes {dimension_semantics = [#tpu.dimension_semantics<parallel>], iteration_bounds = array<i64: 2>, scalar_prefetch = 0 : i64, scratch_operands = 0 : i64, tpu.core_type = #tpu.core_type<tc>, window_params = [{transform_indices = @transform_0, window_bounds = array<i64: 8, 32>}, {pipeline_mode = #tpu.pipeline_mode<synchronous>, transform_indices = @transform_1, window_bounds = array<i64: 32, 64>}, {pipeline_mode = #tpu.pipeline_mode<synchronous>, transform_indices = @transform_2, window_bounds = array<i64: 1, 64>}, {pipeline_mode = #tpu.pipeline_mode<synchronous>, transform_indices = @transform_3, window_bounds = array<i64: 64, 48>}, {pipeline_mode = #tpu.pipeline_mode<synchronous>, transform_indices = @transform_4, window_bounds = array<i64: 1, 48>}, {pipeline_mode = #tpu.pipeline_mode<synchronous>, transform_indices = @transform_5, window_bounds = array<i64: 48, 128>}, {pipeline_mode = #tpu.pipeline_mode<synchronous>, transform_indices = @transform_6, window_bounds = array<i64: 1, 128>}, {transform_indices = @transform_7, window_bounds = array<i64: 8, 128>}]} {
    %c0 = arith.constant 0 : index
    %c0_0 = arith.constant 0 : index
    %0 = vector.load %arg1[%c0, %c0_0] : memref<8x32xf32, #tpu.memory_space<vmem>>, vector<8x32xf32>
    %c0_1 = arith.constant 0 : index
    %c0_2 = arith.constant 0 : index
    %1 = vector.load %arg2[%c0_1, %c0_2] : memref<32x64xf32, #tpu.memory_space<vmem>>, vector<32x64xf32>
    %c0_3 = arith.constant 0 : index
    %c0_4 = arith.constant 0 : index
    %2 = vector.load %arg3[%c0_3, %c0_4] : memref<1x64xf32, #tpu.memory_space<vmem>>, vector<1x64xf32>
    %cst = arith.constant dense<0.000000e+00> : vector<8x64xf32>
    %3 = tpu.matmul %0, %1, %cst {dimension_numbers = #tpu.dot_dimension_numbers<[1], [0], [0], [1], [0, 0, 1, 1], [], []>} : vector<8x32xf32>, vector<32x64xf32>, vector<8x64xf32> -> vector<8x64xf32>
    %4 = vector.broadcast %2 : vector<1x64xf32> to vector<8x64xf32>
    %5 = arith.addf %3, %4 : vector<8x64xf32>
    %cst_5 = arith.constant 1.000000e-01 : f32
    %6 = vector.broadcast %cst_5 : f32 to vector<8x64xf32>
    %7 = arith.mulf %6, %5 : vector<8x64xf32>
    %8 = arith.maximumf %5, %7 : vector<8x64xf32>
    %c0_6 = arith.constant 0 : index
    %c0_7 = arith.constant 0 : index
    %9 = vector.load %arg4[%c0_6, %c0_7] : memref<64x48xf32, #tpu.memory_space<vmem>>, vector<64x48xf32>
    %c0_8 = arith.constant 0 : index
    %c0_9 = arith.constant 0 : index
    %10 = vector.load %arg5[%c0_8, %c0_9] : memref<1x48xf32, #tpu.memory_space<vmem>>, vector<1x48xf32>
    %cst_10 = arith.constant dense<0.000000e+00> : vector<8x48xf32>
    %11 = tpu.matmul %8, %9, %cst_10 {dimension_numbers = #tpu.dot_dimension_numbers<[1], [0], [0], [1], [0, 0, 1, 1], [], []>} : vector<8x64xf32>, vector<64x48xf32>, vector<8x48xf32> -> vector<8x48xf32>
    %12 = vector.broadcast %10 : vector<1x48xf32> to vector<8x48xf32>
    %13 = arith.addf %11, %12 : vector<8x48xf32>
    %cst_11 = arith.constant 1.000000e-01 : f32
    %14 = vector.broadcast %cst_11 : f32 to vector<8x48xf32>
    %15 = arith.mulf %14, %13 : vector<8x48xf32>
    %16 = arith.maximumf %13, %15 : vector<8x48xf32>
    %c0_12 = arith.constant 0 : index
    %c0_13 = arith.constant 0 : index
    %17 = vector.load %arg6[%c0_12, %c0_13] : memref<48x128xf32, #tpu.memory_space<vmem>>, vector<48x128xf32>
    %c0_14 = arith.constant 0 : index
    %c0_15 = arith.constant 0 : index
    %18 = vector.load %arg7[%c0_14, %c0_15] : memref<1x128xf32, #tpu.memory_space<vmem>>, vector<1x128xf32>
    %cst_16 = arith.constant dense<0.000000e+00> : vector<8x128xf32>
    %19 = tpu.matmul %16, %17, %cst_16 {dimension_numbers = #tpu.dot_dimension_numbers<[1], [0], [0], [1], [0, 0, 1, 1], [], []>} : vector<8x48xf32>, vector<48x128xf32>, vector<8x128xf32> -> vector<8x128xf32>
    %20 = vector.broadcast %18 : vector<1x128xf32> to vector<8x128xf32>
    %21 = arith.addf %19, %20 : vector<8x128xf32>
    %c0_17 = arith.constant 0 : index
    %c0_18 = arith.constant 0 : index
    %22 = vector.load %arg8[%c0_17, %c0_18] : memref<8x128xf32, #tpu.memory_space<vmem>>, vector<8x128xf32>
    tpu.vector_store %arg8[%c0_17, %c0_18], %21 {strides = array<i32>} : memref<8x128xf32, #tpu.memory_space<vmem>>, vector<8x128xf32>,
    return
  }
  func.func @transform_0(%arg0: i32) -> (i32, i32) {
    %c0_i32 = arith.constant 0 : i32
    %c0_i32_0 = arith.constant 0 : i32
    return %arg0, %c0_i32 : i32, i32
  }
  func.func @transform_1(%arg0: i32) -> (i32, i32) {
    %c0_i32 = arith.constant 0 : i32
    %c0_i32_0 = arith.constant 0 : i32
    %c0_i32_1 = arith.constant 0 : i32
    return %c0_i32, %c0_i32_0 : i32, i32
  }
  func.func @transform_2(%arg0: i32) -> (i32, i32) {
    %c0_i32 = arith.constant 0 : i32
    %c0_i32_0 = arith.constant 0 : i32
    %c0_i32_1 = arith.constant 0 : i32
    return %c0_i32, %c0_i32_0 : i32, i32
  }
  func.func @transform_3(%arg0: i32) -> (i32, i32) {
    %c0_i32 = arith.constant 0 : i32
    %c0_i32_0 = arith.constant 0 : i32
    %c0_i32_1 = arith.constant 0 : i32
    return %c0_i32, %c0_i32_0 : i32, i32
  }
  func.func @transform_4(%arg0: i32) -> (i32, i32) {
    %c0_i32 = arith.constant 0 : i32
    %c0_i32_0 = arith.constant 0 : i32
    %c0_i32_1 = arith.constant 0 : i32
    return %c0_i32, %c0_i32_0 : i32, i32
  }
  func.func @transform_5(%arg0: i32) -> (i32, i32) {
    %c0_i32 = arith.constant 0 : i32
    %c0_i32_0 = arith.constant 0 : i32
    %c0_i32_1 = arith.constant 0 : i32
    return %c0_i32, %c0_i32_0 : i32, i32
  }
  func.func @transform_6(%arg0: i32) -> (i32, i32) {
    %c0_i32 = arith.constant 0 : i32
    %c0_i32_0 = arith.constant 0 : i32
    %c0_i32_1 = arith.constant 0 : i32
    return %c0_i32, %c0_i32_0 : i32, i32
  }
  func.func @transform_7(%arg0: i32) -> (i32, i32) {
    %c0_i32 = arith.constant 0 : i32
    %c0_i32_0 = arith.constant 0 : i32
    return %arg0, %c0_i32 : i32, i32
  }
}

</mosaic_0001>

<bundles_post_ra>
// kernel: tpu_custom_call.1
= control target key start
LH: loop header
LB: loop body
LE: loop exit
PB: predicated region body
PF: predicated region fallthrough
CT: control target
= control target key end

     0   :  { %12 = vsyncpa [#allocation3], 0  ;;  %s1039_s0 = inlined_call_operand.vmem [shape: f32[16,32], index: 0, kind: input, shape index: {}]   ;;  %s1040_s1 = inlined_call_operand.vmem [shape: f32[32,64], index: 1, kind: input, shape index: {}]   ;;  %s1041_s2 = inlined_call_operand.vmem [shape: f32[1,64], index: 2, kind: input, shape index: {}]   ;;  %s1042_s3 = inlined_call_operand.vmem [shape: f32[64,48], index: 3, kind: input, shape index: {}]   ;;  %s1043_s4 = inlined_call_operand.vmem [shape: f32[1,48], index: 4, kind: input, shape index: {}]   ;;  %s1044_s5 = inlined_call_operand.vmem [shape: f32[48,128], index: 5, kind: input, shape index: {}]   ;;  %s1045_s6 = inlined_call_operand.vmem [shape: f32[1,128], index: 6, kind: input, shape index: {}]   ;;  %s1046_s7 = inlined_call_operand.hbm [shape: f32[16,128], index: 7, kind: output, shape index: {}]  }
   0x1   :  { %14 = vsyncpa [#allocation3 + $0x1], 0  ;;  %s873_s24 = smov 0   ;;  %s875_s25 = smov 0  }
   0x2   :  { %s877_s26 = smov 0   ;;  %s879_s27 = smov 0  }
   0x3 LB: > { %s894_s28 = sadd.s32 4294967295, %s827_s27   ;;  %s614_s29 = sadd.s32 4294967294, %s827_s27   ;;  %s827_s27 = sphi %s879_s27, %s1052_s27   ;;  %s823_s26 = sphi %s877_s26, %s1051_s26   ;;  %s819_s25 = sphi %s875_s25, %s1050_s25   ;;  %s815_s24 = sphi %s873_s24, %s1049_s24  }
   0x4   : > { %s898_s30 = sadd.s32 1, %s827_s27   ;;  %s179_s8 = sadd.s32 1, %s823_s26 }
   0x5   : > { %s176_s9 = ssub.s32 %s827_s27, %s898_s30  ;;  %p189_p0 = scmp.ne.s32.totalorder %s823_s26, %s819_s25 }
   0x6   : > { %p177_p1 = scmp.eq.s32.totalorder %s176_s9, 0  ;;  %p190_p2 = scmp.eq.s32.totalorder %s894_s28, 1 }
   0x7   : > { %p195_p3 = scmp.ne.s32.totalorder %s819_s25, %s815_s24  ;;  %p196_p4 = scmp.eq.s32.totalorder %s614_s29, 1 }
   0x8   : > { %s909_s10 = scalar_select %p177_p1, %s823_s26, %s179_s8  }
   0x9   : > { %p911_p5 = por %p190_p2, %p189_p0  ;;  %p915_p6 = por %p196_p4, %p195_p3 }
   0xa   : > { %p617_p7 = scmp.ge.s32.totalorder %s827_s27, 1  ;;  %p239_p8 = scmp.lt.s32.totalorder %s827_s27, 3 }
   0xc   : > { %p240_p9 = pnand %p617_p7, %p239_p8 }
   0xd   : > { %v275_v0 = vld [vmem:[%s1040_s1] sm:$0xff] (!%p240_p9)  ;;  %v276_v1 = vld [vmem:[%s1040_s1 + $0x8] sm:$0xff] (!%p240_p9)  ;;  %v277_v2 = vld [vmem:[%s1040_s1 + $0x10] sm:$0xff] (!%p240_p9)  ;;  %v829_v3 = vmov (!%p240_p9), 0.0|0.0   ;;  %vm830_vm0 = vmmov (!%p240_p9), 0   ;;  %v831_v6 = vmov (!%p240_p9), 0.0  }
   0xe   : > { %243 = sbr.rel (%p240_p9) target bundleno = 690 (0x2b2), region = 48  ;;  %696 = vmatprep.subr.bf16.mxu0 (!%p240_p9), %v829_v3  ;;  %v697_v4 = vpack.c.bf16 (!%p240_p9), %v276_v1, %v275_v0  ;;  %v278_v5 = vld [vmem:[%s1040_s1 + $0x18] sm:$0xff] (!%p240_p9)  ;;  %659 = vmatprep.mubr.msk.f32.mxu0 (!%p240_p9), %vm830_vm0, %v831_v6  ;;  %p270_p10 = scmp.lt.s32.totalorder (!%p240_p9), %s894_s28, 1  ;;  %v362_v7 = vld [vmem:[%s1042_s3] sm:$0xff] (!%p240_p9)  ;;  %v363_v8 = vld [vmem:[%s1042_s3 + $0x8] sm:$0xff] (!%p240_p9)  ;;  %vm286_vm1 = vcmask (!%p240_p9), 261120  }
   0xf   : > { %702 = vmatprep.subr.bf16.mxu1 (!%p240_p9), %v829_v3  ;;  %v703_v9 = vpack.c.bf16 (!%p240_p9), %v363_v8, %v362_v7  ;;  %v364_v10 = vld [vmem:[%s1042_s3 + $0x10] sm:$0xff] (!%p240_p9)  ;;  %v365_v11 = vld [vmem:[%s1042_s3 + $0x18] sm:$0xff] (!%p240_p9)  ;;  %678 = vmatprep.mubr.msk.f32.mxu1 (!%p240_p9), %vm830_vm0, %v831_v6  ;;  %v700_v12 = vpack.c.bf16 (!%p240_p9), %v278_v5, %v277_v2  ;;  %v366_v15 = vld [vmem:[%s1042_s3 + $0x20] sm:$0xff] (!%p240_p9)  ;;  %vm377_vm2 = vcmask (!%p240_p9), 523264   ;;  %vm466_vm3 = vcmask (!%p240_p9), 392192   ;;  %s627_s20 = sshll.u32 (!%p240_p9), %s894_s28, 7 }
  0x10   : > { %698 = vmatpush3.bf16.msra.mxu0 (!%p240_p9), %v697_v4  ;;  %v706_v13 = vpack.c.bf16 (!%p240_p9), %v365_v11, %v364_v10  ;;  %v367_v16 = vld [vmem:[%s1042_s3 + $0x28] sm:$0xff] (!%p240_p9)  ;;  %v368_v18 = vld [vmem:[%s1042_s3 + $0x30] sm:$0xff] (!%p240_p9)  ;;  %v369_v19 = vld [vmem:[%s1042_s3 + $0x38] sm:$0xff] (!%p240_p9)  ;;  %s997_s8 = scalar_lea.hbm (!%p240_p9), %s1046_s7, %s627_s20 }
  0x11   : > { %699 = vmatprep.subr.bf16.mxu0 (!%p240_p9), %v829_v3  ;;  %704 = vmatpush3.bf16.msra.mxu1 (!%p240_p9), %v703_v9  ;;  %v709_v17 = vpack.c.bf16 (!%p240_p9), %v367_v16, %v366_v15  ;;  %v712_v20 = vpack.c.bf16 (!%p240_p9), %v369_v19, %v368_v18  ;;  %v453_v21 = vld [vmem:[%s1044_s5] sm:$0xff] (!%p240_p9)  ;;  %v454_v22 = vld [vmem:[%s1044_s5 + $0x8] sm:$0xff] (!%p240_p9)  ;;  %v455_v30 = vld [vmem:[%s1044_s5 + $0x10] sm:$0xff] (!%p240_p9) }
  0x12   : > { %705 = vmatprep.subr.bf16.mxu1 (!%p240_p9), %v829_v3  ;;  %v715_v23 = vpack.c.bf16 (!%p240_p9), %v454_v22, %v453_v21  ;;  %v620_v24 = vld [vmem:[%s1041_s2] ss:$0 sm:$0xff] (!%p240_p9)  ;;  %v456_v31 = vld [vmem:[%s1044_s5 + $0x18] sm:$0xff] (!%p240_p9)  ;;  %v458_v34 = vld [vmem:[%s1044_s5 + $0x28] sm:$0xff] (!%p240_p9) }
  0x13   : > { %v718_v32 = vpack.c.bf16 (!%p240_p9), %v456_v31, %v455_v30  ;;  %v457_v33 = vld [vmem:[%s1044_s5 + $0x20] sm:$0xff] (!%p240_p9) }
  0x14   : > { %701 = vmatpush3.bf16.msra.mxu0 (!%p240_p9), %v700_v12  ;;  %v721_v35 = vpack.c.bf16 (!%p240_p9), %v458_v34, %v457_v33  ;;  %v622_v36 = vld [vmem:[%s1043_s4] ss:$0 sm:$0xff] (!%p240_p9) }
  0x15   : > { %s271_s15 = scalar_select %p270_p10, %s894_s28, 1  ;;  %707 = vmatpush3.bf16.msra.mxu1 %v706_v13  ;;  %714 = vmatprep.subr.bf16.mxu0 %v829_v3  ;;  %v624_v42 = vld [vmem:[%s1045_s6] ss:$0 sm:$0xff] }
  0x16   : > { %708 = vmatprep.subr.bf16.mxu1 %v829_v3  ;;  %s832_s28 = smov [#allocation2]  }
  0x17   : > { %s619_s16 = sshll.u32 %s271_s15, 3  ;;  %s769_s14 = sshll.u32 %s832_s28, 4  ;;  %s770_s14 = int_to_ptr.vmem [resolvable:$false] %s769_s14 }
  0x18   : > { %s273_s19 = scalar_lea.vmem %s1039_s0, %s619_s16  ;;  %s267_s16 = sand.u32 1, %s819_s25  }
  0x19   : > { %v274_v14 = vld [vmem:[%s273_s19] sm:$0xff]  ;;  %710 = vmatpush3.bf16.msra.mxu1 %v709_v17  ;;  %s618_s17 = sshll.u32 %s267_s16, 3  ;;  %s542_s9 = scalar_lea.sflag [#allocation3], %s267_s16 }
  0x1a   : > { %660 = vmatmul.mubr.msk.f32.vlgmr.msra.gmra.mrb[0].mxu0 %vm286_vm1, %v274_v14  ;;  %711 = vmatprep.subr.bf16.mxu1 %v829_v3  ;;  %s269_s21 = scalar_lea.vmem [#allocation2], %s618_s17  ;;  %s771_s15 = scalar_lea.vmem %s770_s14, 256 }
  0x1b   : > { %693 = vmatprep.mubr.msk.f32.mxu0 %vm830_vm0, %v831_v6  ;;  %716 = vmatpush3.bf16.msra.mxu0 %v715_v23  ;;  %s555_s22 = sshll.u32 %s269_s21, 4  ;;  %s999_s22 = int_to_ptr.vmem [resolvable:$true] %s555_s22 }
  0x1c   : > { %717 = vmatprep.subr.bf16.mxu0 %v829_v3  ;;  %s765_s13 = scalar_lea.vmem %s999_s22, 128  ;;  %p772_p0 = scmp.lt.s32.totalorder %s999_s22, %s770_s14 }
  0x1d   : > { %713 = vmatpush3.bf16.msra.mxu1 %v712_v20  ;;  %p766_p11 = scmp.ne.s32.totalorder %s999_s22, %s765_s13  ;;  %p773_p1 = scmp.lt.s32.totalorder %s771_s15, %s765_s13 }
  0x1f   : > { %719 = vmatpush3.bf16.msra.mxu0 %v718_v32  ;;  %p767_p12 = pnand %p766_p11, %p911_p5  ;;  %p774_p2 = por %p773_p1, %p772_p0 }
  0x20   : > { %720 = vmatprep.subr.bf16.mxu0 %v829_v3 }
  0x21   : > { %p768_p13 = pneg %p767_p12 }
  0x23   : > { %722 = vmatpush3.bf16.msra.mxu0 %v721_v35  ;;  %p775_p3 = pnand %p774_p2, %p768_p13 }
  0xed   : > { %v356_v25 = vpop.f32.mrb[0].mxu0 }
  0xee   : > { %v357_v26 = vadd.f32 %v620_v24, %v356_v25  ;;  %v661_v27 = vpop.f32.mrb[1].mxu0 }
  0xf0   : > { %v360_v28 = vmul.f32 0.1, %v357_v26 }
  0xf2   : > { %v361_v29 = vmax.f32 %v357_v26, %v360_v28 }
  0xf4   : > { %679 = vmatmul.mubr.msk.f32.vlgmr.msra.gmra.mrb[0].mxu1 %vm377_vm2, %v361_v29 }
 0x1c7   : > { %v447_v37 = vpop.f32.mrb[0].mxu1 }
 0x1c8   : > { %v448_v38 = vadd.f32 %v622_v36, %v447_v37  ;;  %v680_v39 = vpop.f32.mrb[1].mxu1 }
 0x1ca   : > { %v451_v40 = vmul.f32 0.1, %v448_v38 }
 0x1cc   : > { %v452_v41 = vmax.f32 %v448_v38, %v451_v40 }
 0x1ce   : > { %694 = vmatmul.mubr.msk.f32.vlgmr.msra.gmra.mrb[2].mxu0 %vm466_vm3, %v452_v41 }
 0x2a1   : > { %v536_v43 = vpop.f32.mrb[2].mxu0 }
 0x2a2   : > { %v537_v44 = vadd.f32 %v624_v42, %v536_v43  ;;  %v695_v45 = vpop.f32.mrb[3].mxu0 }
 0x2a4   : > { %540 = vst [vmem:[%s269_s21] sm:$0xff] %v537_v44 }
 0x2a5   : > { %778 = shalt.err (!%p775_p3)
}
 0x2a6   : > { %s779_s16 = scalar_lea.hbm %s997_s8, 128  ;;  %s783_s19 = scalar_lea.hbm %s1046_s7, 256 }
 0x2a7   : > { %p780_p4 = scmp.ne.s32.totalorder %s997_s8, %s779_s16  ;;  %p784_p9 = scmp.lt.u32.totalorder %s997_s8, %s1046_s7 }
 0x2a8   : > { %p785_p10 = scmp.lt.u32.totalorder %s783_s19, %s779_s16  ;;  %p787_p12 = scmp.lt.u32.totalorder %s779_s16, %s997_s8 }
 0x2a9   : > { %p781_p7 = pnand %p780_p4, %p911_p5 }
 0x2aa   : > { %p786_p11 = por %p785_p10, %p784_p9 }
 0x2ab   : > { %p782_p8 = pneg %p781_p7 }
 0x2ac   : > { %p788_p13 = por %p787_p12, %p786_p11 }
 0x2ae   : > { %p789_p0 = pnand %p788_p13, %p782_p8 }
 0x2b0   : > { %792 = shalt.err (!%p789_p0)
}
 0x2b1   : > { %723 = dma.vmem_to_hbm [thread:$0]  (%p911_p5), %s999_s22, 128, %s997_s8, %s542_s9  }
 0x2b2 PF: > { %p729_p1 = scmp.ge.s32.totalorder %s827_s27, 2  ;;  %s567_s23 = sand.u32 1, %s815_s24  }
 0x2b3   : > { %s568_s29 = scalar_lea.sflag [#allocation3], %s567_s23 }
 0x2b4   : > { %p726_p2 = pnand %p729_p1, %p915_p6 }
 0x2b6   : > { %810 = dma.done.wait (!%p726_p2), %s568_s29, 128  }
 0x2b7   : > { %812 = vsyncadd (!%p726_p2), %s568_s29, 4294967168  ;;  %p17_p3 = scmp.ge.s32.totalorder %s898_s30, 4   ;;  %s1049_s24 = smov %s819_s25 }
 0x2b8   : > { %s1050_s25 = smov %s823_s26  ;;  %s1051_s26 = smov %s909_s10 }
 0x2b9   : > { %s1052_s27 = smov %s898_s30  ;;  %19 = sbr.rel (!%p17_p3) target bundleno = 3 (0x3), region = 83 }
 0x2c0   :  { %573 = vsyncpa [#allocation3], 1 }
 0x2c1   :  { %575 = vsyncpa [#allocation3 + $0x1], 1 }

</bundles_post_ra>
